<compile_context>
chip_gen: v6e
topology: v6e:2x2x1
jax: 0.10.0
libtpu: 0.0.40
codegen_flags: <defaults>
</compile_context>

<pallas_src>
import functools

import jax
import jax.numpy as jnp
from jax.experimental import pallas as pl
from jax.experimental.pallas import tpu as pltpu


def _round_up(n: int, m: int) -> int:
    return ((n + m - 1) // m) * m


def _mlp_kernel(xt_ref, w1_ref, b1_ref, w2_ref, b2_ref, w3_ref, b3_ref, o_ref,
                *, linear: bool):
    """One batch tile: 2 MXU matmuls + VPU/XLU final layer, lane-dense store."""
    act = (lambda v: v) if linear else (lambda v: jnp.maximum(v, 0.0))

    # x already arrives as [input_size, TB] (batch on the lane axis) — no
    # in-kernel transpose.
    xt = xt_ref[...]

    # fc1 + activation: (H1, in) @ (in, TB) -> (H1, TB) f32; bias is (H1, 1).
    h1 = act(jnp.dot(w1_ref[...], xt, preferred_element_type=jnp.float32)
             + b1_ref[...])

    # fc2 + activation: (H2, H1) @ (H1, TB) -> (H2, TB) f32; bias is (H2, 1).
    # h1 is cast to the matmul dtype (bf16 by default) so the MXU runs native
    # bf16 passes; accumulation stays f32.
    h2 = act(jnp.dot(w2_ref[...], h1.astype(w2_ref.dtype),
                     preferred_element_type=jnp.float32)
             + b2_ref[...])

    # fc3 (single output unit): VPU multiply + sublane reduce instead of an
    # MXU matmul with one output column.  Result is lane-dense (1, TB).
    logits = jnp.sum(h2 * w3_ref[...], axis=0, keepdims=True) + b3_ref[0, 0]

    # torch.tanh_ is just tanh applied to the fc3 output.
    o_ref[...] = jnp.tanh(logits).astype(o_ref.dtype)


def simple_nn_forward(x, params, *, linear: bool = False,
                      block_batch: int = 2048,
                      matmul_dtype=jnp.bfloat16):
    """Run the SimpleNN forward pass with a batched, pipelined pallas_call.

    x: [B, input_size] float32
    params: dict with
        w1 [H1, in], b1 [H1, 1], w2 [H2, H1], b2 [H2, 1], w3 [H2, 1], b3 [1, 1]
    returns: [B, 1] float32
    """
    w1, b1 = params["w1"], params["b1"]
    w2, b2 = params["w2"], params["b2"]
    w3, b3 = params["w3"], params["b3"]
    B, in_features = x.shape

    # Batch tile: multiple of 128 (lane width) so both the (in, TB) input and
    # the (1, TB) output blocks are lane-dense.  Default 2048 amortizes the
    # ~0.35 us per-grid-step overhead; a lane-dense (16, 2048) f32 tile is
    # only 128 KiB so double-buffering stays tiny.
    TB = max(128, _round_up(min(block_batch, _round_up(B, 128)), 128))
    # Guarantee >= 2 grid steps when the batch allows so the "parallel" batch
    # axis occupies both v7x TensorCores (harmless on v5e/v6e).
    if B > 128:
        TB = min(TB, _round_up(-(-B // 2), 128))
    B_pad = _round_up(B, TB)
    num_tiles = B_pad // TB

    if B_pad != B:
        x = jnp.pad(x, ((0, B_pad - B), (0, 0)))

    # Wrapper-side layout plumbing / one-time casts (outside the kernel):
    #   x -> [in_features, B_pad] in the matmul dtype, w1/w2 -> matmul dtype.
    xt = x.T.astype(matmul_dtype)
    w1m = w1.astype(matmul_dtype)
    w2m = w2.astype(matmul_dtype)

    kernel = functools.partial(_mlp_kernel, linear=linear)

    resident = lambda a: pl.BlockSpec(a.shape, lambda i: (0, 0))

    out_row = pl.pallas_call(
        kernel,
        out_shape=jax.ShapeDtypeStruct((1, B_pad), jnp.float32),
        grid_spec=pltpu.PrefetchScalarGridSpec(
            num_scalar_prefetch=0,
            grid=(num_tiles,),
            in_specs=[
                pl.BlockSpec((in_features, TB), lambda i: (0, i)),  # x tile
                resident(w1m), resident(b1),
                resident(w2m), resident(b2),
                resident(w3),
                pl.BlockSpec(memory_space=pltpu.MemorySpace.SMEM),  # b3 scalar
            ],
            out_specs=pl.BlockSpec((1, TB), lambda i: (0, i)),      # lane-dense
        ),
        compiler_params=pltpu.CompilerParams(
            dimension_semantics=("parallel",),
            vmem_limit_bytes=32 * 1024 * 1024),
    )(xt, w1m, b1, w2m, b2, w3, b3)

    # Layout plumbing only: (1, B_pad) -> (B, 1).
    return out_row.reshape(B_pad, 1)[:B]


def init_params(key, input_size, hidden_size_1, hidden_size_2):
    """Deterministic init matching nn.Linear (weights stored [out, in])."""
    k1, k2, k3, k4, k5, k6 = jax.random.split(key, 6)

    def unif(k, shape, fan_in):
        bound = 1.0 / jnp.sqrt(fan_in)  # PyTorch nn.Linear default range
        return jax.random.uniform(k, shape, jnp.float32, -bound, bound)

    return {
        "w1": unif(k1, (hidden_size_1, input_size), input_size),
        "b1": unif(k2, (hidden_size_1, 1), input_size),
        "w2": unif(k3, (hidden_size_2, hidden_size_1), hidden_size_1),
        "b2": unif(k4, (hidden_size_2, 1), hidden_size_1),
        # fc3 weight is (1, H2) in PyTorch; stored here as the (H2, 1) column.
        "w3": unif(k5, (hidden_size_2, 1), hidden_size_2),
        "b3": unif(k6, (1, 1), hidden_size_2),
    }


def reference_forward(x, params, *, linear: bool = False):
    """Pure-JAX f32 reference for verification."""
    f = (lambda v: v) if linear else jax.nn.relu
    h1 = f(x @ params["w1"].T + params["b1"].T)
    h2 = f(h1 @ params["w2"].T + params["b2"].T)
    return jnp.tanh(h2 @ params["w3"] + params["b3"])


# TODO(synk): training loop (Adam / BCEWithLogitsLoss), ROC and confusion-matrix
# utilities of the PyTorch module are host-side and not part of the kernel.

if __name__ == "__main__":
    key = jax.random.PRNGKey(0)
    kx, kp = jax.random.split(key)

    input_size, hidden_size_1, hidden_size_2 = 16, 32, 32
    params = init_params(kp, input_size, hidden_size_1, hidden_size_2)

    batch = 512
    x = jax.random.normal(kx, (batch, input_size), dtype=jnp.float32)
    ref = reference_forward(x, params, linear=False)

    # Exact-semantics check with f32 MXU operands (tight tolerance).
    out_f32 = jax.block_until_ready(
        simple_nn_forward(x, params, linear=False, matmul_dtype=jnp.float32))
    assert out_f32.shape == (batch, 1)
    assert jnp.allclose(out_f32, ref, atol=1e-5, rtol=1e-5)

    # Default bf16-operand / f32-accumulate MXU path (loose tolerance).
    out_bf16 = jax.block_until_ready(simple_nn_forward(x, params, linear=False))
    assert out_bf16.shape == (batch, 1)
    assert jnp.allclose(out_bf16, ref, atol=3e-2, rtol=3e-2)

    # Ragged batch (not a tile multiple) exercises the padding/slicing path,
    # plus the linear=True activation switch.
    x_small = jax.random.normal(jax.random.PRNGKey(1), (200, input_size),
                                dtype=jnp.float32)
    out_small = jax.block_until_ready(
        simple_nn_forward(x_small, params, linear=True,
                          matmul_dtype=jnp.float32))
    assert out_small.shape == (200, 1)
    assert jnp.allclose(out_small,
                        reference_forward(x_small, params, linear=True),
                        atol=1e-5, rtol=1e-5)

    print("KERNEL_OK")
</pallas_src>

<mosaic_0001>
module attributes {stable_mosaic.version = 11 : i64} {
  func.func @_mlp_kernel(%arg0: i32, %arg1: memref<16x256xf32, #tpu.memory_space<vmem>>, %arg2: memref<32x16xf32, #tpu.memory_space<vmem>>, %arg3: memref<32x1xf32, #tpu.memory_space<vmem>>, %arg4: memref<32x32xf32, #tpu.memory_space<vmem>>, %arg5: memref<32x1xf32, #tpu.memory_space<vmem>>, %arg6: memref<32x1xf32, #tpu.memory_space<vmem>>, %arg7: memref<1x1xf32, #tpu.memory_space<smem>>, %arg8: memref<1x256xf32, #tpu.memory_space<vmem>>) attributes {dimension_semantics = [#tpu.dimension_semantics<parallel>], iteration_bounds = array<i64: 2>, scalar_prefetch = 0 : i64, scratch_operands = 0 : i64, tpu.core_type = #tpu.core_type<tc>, window_params = [{transform_indices = @transform_0, window_bounds = array<i64: 16, 256>}, {pipeline_mode = #tpu.pipeline_mode<synchronous>, transform_indices = @transform_1, window_bounds = array<i64: 32, 16>}, {pipeline_mode = #tpu.pipeline_mode<synchronous>, transform_indices = @transform_2, window_bounds = array<i64: 32, 1>}, {pipeline_mode = #tpu.pipeline_mode<synchronous>, transform_indices = @transform_3, window_bounds = array<i64: 32, 32>}, {pipeline_mode = #tpu.pipeline_mode<synchronous>, transform_indices = @transform_4, window_bounds = array<i64: 32, 1>}, {pipeline_mode = #tpu.pipeline_mode<synchronous>, transform_indices = @transform_5, window_bounds = array<i64: 32, 1>}, {transform_indices = @transform_6, window_bounds = array<i64: 1, 1>}, {transform_indices = @transform_7, window_bounds = array<i64: 1, 256>}]} {
    %c0 = arith.constant 0 : index
    %c0_0 = arith.constant 0 : index
    %0 = vector.load %arg1[%c0, %c0_0] : memref<16x256xf32, #tpu.memory_space<vmem>>, vector<16x256xf32>
    %c0_1 = arith.constant 0 : index
    %c0_2 = arith.constant 0 : index
    %1 = vector.load %arg2[%c0_1, %c0_2] : memref<32x16xf32, #tpu.memory_space<vmem>>, vector<32x16xf32>
    %cst = arith.constant dense<0.000000e+00> : vector<32x256xf32>
    %2 = tpu.matmul %1, %0, %cst {dimension_numbers = #tpu.dot_dimension_numbers<[1], [0], [0], [1], [0, 0, 1, 1], [], []>} : vector<32x16xf32>, vector<16x256xf32>, vector<32x256xf32> -> vector<32x256xf32>
    %c0_3 = arith.constant 0 : index
    %c0_4 = arith.constant 0 : index
    %3 = vector.load %arg3[%c0_3, %c0_4] : memref<32x1xf32, #tpu.memory_space<vmem>>, vector<32x1xf32>
    %4 = vector.broadcast %3 : vector<32x1xf32> to vector<32x256xf32>
    %5 = arith.addf %2, %4 : vector<32x256xf32>
    %cst_5 = arith.constant 0.000000e+00 : f32
    %6 = vector.broadcast %cst_5 : f32 to vector<32x256xf32>
    %7 = arith.maximumf %5, %6 : vector<32x256xf32>
    %c0_6 = arith.constant 0 : index
    %c0_7 = arith.constant 0 : index
    %8 = vector.load %arg4[%c0_6, %c0_7] : memref<32x32xf32, #tpu.memory_space<vmem>>, vector<32x32xf32>
    %cst_8 = arith.constant dense<0.000000e+00> : vector<32x256xf32>
    %9 = tpu.matmul %8, %7, %cst_8 {dimension_numbers = #tpu.dot_dimension_numbers<[1], [0], [0], [1], [0, 0, 1, 1], [], []>} : vector<32x32xf32>, vector<32x256xf32>, vector<32x256xf32> -> vector<32x256xf32>
    %c0_9 = arith.constant 0 : index
    %c0_10 = arith.constant 0 : index
    %10 = vector.load %arg5[%c0_9, %c0_10] : memref<32x1xf32, #tpu.memory_space<vmem>>, vector<32x1xf32>
    %11 = vector.broadcast %10 : vector<32x1xf32> to vector<32x256xf32>
    %12 = arith.addf %9, %11 : vector<32x256xf32>
    %cst_11 = arith.constant 0.000000e+00 : f32
    %13 = vector.broadcast %cst_11 : f32 to vector<32x256xf32>
    %14 = arith.maximumf %12, %13 : vector<32x256xf32>
    %c0_12 = arith.constant 0 : index
    %c0_13 = arith.constant 0 : index
    %15 = vector.load %arg6[%c0_12, %c0_13] : memref<32x1xf32, #tpu.memory_space<vmem>>, vector<32x1xf32>
    %16 = vector.broadcast %15 : vector<32x1xf32> to vector<32x256xf32>
    %17 = arith.mulf %14, %16 : vector<32x256xf32>
    %cst_14 = arith.constant dense<0.000000e+00> : vector<256xf32>
    %18 = vector.multi_reduction <add>, %17, %cst_14 [0] : vector<32x256xf32> to vector<256xf32>
    %19 = vector.shape_cast %18 : vector<256xf32> to vector<1x256xf32>
    %c0_15 = arith.constant 0 : index
    %c0_16 = arith.constant 0 : index
    %20 = memref.load %arg7[%c0_15, %c0_16] : memref<1x1xf32, #tpu.memory_space<smem>>
    %21 = vector.broadcast %20 : f32 to vector<1x256xf32>
    %22 = arith.addf %19, %21 : vector<1x256xf32>
    %23 = math.tanh %22 : vector<1x256xf32>
    %c0_17 = arith.constant 0 : index
    %c0_18 = arith.constant 0 : index
    %24 = vector.load %arg8[%c0_17, %c0_18] : memref<1x256xf32, #tpu.memory_space<vmem>>, vector<1x256xf32>
    tpu.vector_store %arg8[%c0_17, %c0_18], %23 {strides = array<i32>} : memref<1x256xf32, #tpu.memory_space<vmem>>, vector<1x256xf32>,
    return
  }
  func.func @transform_0(%arg0: i32) -> (i32, i32) {
    %c0_i32 = arith.constant 0 : i32
    %c0_i32_0 = arith.constant 0 : i32
    return %c0_i32, %arg0 : i32, i32
  }
  func.func @transform_1(%arg0: i32) -> (i32, i32) {
    %c0_i32 = arith.constant 0 : i32
    %c0_i32_0 = arith.constant 0 : i32
    %c0_i32_1 = arith.constant 0 : i32
    return %c0_i32, %c0_i32_0 : i32, i32
  }
  func.func @transform_2(%arg0: i32) -> (i32, i32) {
    %c0_i32 = arith.constant 0 : i32
    %c0_i32_0 = arith.constant 0 : i32
    %c0_i32_1 = arith.constant 0 : i32
    return %c0_i32, %c0_i32_0 : i32, i32
  }
  func.func @transform_3(%arg0: i32) -> (i32, i32) {
    %c0_i32 = arith.constant 0 : i32
    %c0_i32_0 = arith.constant 0 : i32
    %c0_i32_1 = arith.constant 0 : i32
    return %c0_i32, %c0_i32_0 : i32, i32
  }
  func.func @transform_4(%arg0: i32) -> (i32, i32) {
    %c0_i32 = arith.constant 0 : i32
    %c0_i32_0 = arith.constant 0 : i32
    %c0_i32_1 = arith.constant 0 : i32
    return %c0_i32, %c0_i32_0 : i32, i32
  }
  func.func @transform_5(%arg0: i32) -> (i32, i32) {
    %c0_i32 = arith.constant 0 : i32
    %c0_i32_0 = arith.constant 0 : i32
    %c0_i32_1 = arith.constant 0 : i32
    return %c0_i32, %c0_i32_0 : i32, i32
  }
  func.func @transform_6(%arg0: i32) -> (i32, i32) {
    %c0_i32 = arith.constant 0 : i32
    %c0_i32_0 = arith.constant 0 : i32
    %c0_i32_1 = arith.constant 0 : i32
    return %c0_i32, %c0_i32_0 : i32, i32
  }
  func.func @transform_7(%arg0: i32) -> (i32, i32) {
    %c0_i32 = arith.constant 0 : i32
    %c0_i32_0 = arith.constant 0 : i32
    return %c0_i32, %arg0 : i32, i32
  }
}

</mosaic_0001>

<bundles_post_ra>
// kernel: tpu_custom_call.1
= control target key start
LH: loop header
LB: loop body
LE: loop exit
PB: predicated region body
PF: predicated region fallthrough
CT: control target
= control target key end

     0   :  { %s1095_s0 = inlined_call_operand.vmem [shape: f32[16,512], index: 0, kind: input, shape index: {}]   ;;  %s1096_s1 = inlined_call_operand.vmem [shape: f32[32,16], index: 1, kind: input, shape index: {}]   ;;  %s1097_s2 = inlined_call_operand.vmem [shape: f32[32,1], index: 2, kind: input, shape index: {}]   ;;  %s1098_s3 = inlined_call_operand.vmem [shape: f32[32,32], index: 3, kind: input, shape index: {}]   ;;  %s1099_s4 = inlined_call_operand.vmem [shape: f32[32,1], index: 4, kind: input, shape index: {}]   ;;  %s1100_s5 = inlined_call_operand.vmem [shape: f32[32,1], index: 5, kind: input, shape index: {}]   ;;  %s1101_s6 = inlined_call_operand.<no memory space> [shape: f32[1,1], index: 6, kind: input, shape index: {}]   ;;  %s1102_s7 = inlined_call_operand.hbm [shape: f32[1,512], index: 7, kind: output, shape index: {}]  }
   0x1   :  { %12 = sst [smem:[#allocation2]] %s1101_s6 }
   0x2   :  { %13 = vsyncpa [#allocation5], 0 }
   0x3   :  { %15 = vsyncpa [#allocation5 + $0x1], 0  ;;  %s926_s26 = smov 0   ;;  %s928_s27 = smov 0  }
   0x4   :  { %s930_s28 = smov 0   ;;  %s932_s29 = smov 0  }
   0x5 LB: > { %s744_s6 = sadd.s32 4294967295, %s877_s29   ;;  %s745_s30 = sadd.s32 4294967294, %s877_s29   ;;  %s877_s29 = sphi %s932_s29, %s1110_s29   ;;  %s873_s28 = sphi %s930_s28, %s1109_s28   ;;  %s869_s27 = sphi %s928_s27, %s1108_s27   ;;  %s865_s26 = sphi %s926_s26, %s1107_s26  }
   0x6   : > { %s949_s8 = sadd.s32 1, %s877_s29   ;;  %s28_s9 = sadd.s32 1, %s873_s28 }
   0x7   : > { %s25_s10 = ssub.s32 %s877_s29, %s949_s8  ;;  %p35_p0 = scmp.ne.s32.totalorder %s873_s28, %s869_s27 }
   0x8   : > { %p26_p1 = scmp.eq.s32.totalorder %s25_s10, 0  ;;  %p36_p2 = scmp.eq.s32.totalorder %s877_s29, 0 }
   0x9   : > { %p191_p3 = scmp.eq.s32.totalorder %s744_s6, 1  ;;  %p196_p4 = scmp.ne.s32.totalorder %s869_s27, %s865_s26 }
   0xa   : > { %s962_s11 = scalar_select %p26_p1, %s873_s28, %s28_s9  }
   0xb   : > { %p37_p5 = por %p36_p2, %p35_p0  ;;  %p964_p6 = por %p191_p3, %p35_p0 }
   0xc   : > { %p197_p7 = scmp.eq.s32.totalorder %s745_s30, 1  ;;  %p1103_p9 = scmp.ge.s32.totalorder %s877_s29, 2 }
   0xe   : > { %p968_p8 = por %p197_p7, %p196_p4  ;;  %231 = sbr.rel (%p1103_p9) target bundleno = 25 (0x19), region = 40 }
  0x13   : > { %234 = sbr.rel (!%p37_p5) target bundleno = 25 (0x19), region = 44  ;;  %s236_s14 = sand.u32 (%p37_p5), 1, %s873_s28  }
  0x14   : > { %s767_s15 = sshll.u32 (%p37_p5), %s877_s29, 4  ;;  %s748_s16 = sshll.u32 (%p37_p5), %s236_s14, 5 }
  0x15   : > { %s241_s19 = scalar_lea.vmem (%p37_p5), %s1095_s0, %s767_s15  ;;  %s238_s20 = scalar_lea.vmem (%p37_p5), [#allocation3], %s748_s16 }
  0x16   : > { %v254_v0 = vld [vmem:[%s241_s19] sm:$0xff] (%p37_p5)  ;;  %v256_v1 = vld [vmem:[%s241_s19 + $0x8] sm:$0xff] (%p37_p5) }
  0x17   : > { %v258_v2 = vld [vmem:[%s241_s19 + $0x20] sm:$0xff] (%p37_p5)  ;;  %255 = vst [vmem:[%s238_s20] sm:$0xff] (%p37_p5), %v254_v0  ;;  %257 = vst [vmem:[%s238_s20 + $0x8] sm:$0xff] (%p37_p5), %v256_v1  ;;  %v260_v3 = vld [vmem:[%s241_s19 + $0x28] sm:$0xff] (%p37_p5) }
  0x18   : > { %259 = vst [vmem:[%s238_s20 + $0x10] sm:$0xff] %v258_v2  ;;  %261 = vst [vmem:[%s238_s20 + $0x18] sm:$0xff] %v260_v3 }
  0x19 PF: > { %p751_p10 = scmp.ge.s32.totalorder %s877_s29, 1  ;;  %p266_p11 = scmp.lt.s32.totalorder %s877_s29, 3 }
  0x1b   : > { %p267_p12 = pnand %p751_p10, %p266_p11 }
  0x1c   : > { %s983_s21 = sand.u32 (!%p267_p12), 1, %s869_s27   ;;  %s768_s24 = sshll.u32 (!%p267_p12), %s744_s6, 5 }
  0x1d   : > { %270 = sbr.rel (%p267_p12) target bundleno = 523 (0x20b), region = 67  ;;  %s752_s22 = sshll.u32 (!%p267_p12), %s983_s21, 5 }
  0x1e   : > { %s275_s9 = scalar_lea.vmem (!%p267_p12), [#allocation3], %s752_s22  ;;  %s636_s22 = sld [smem:[#allocation2]] (!%p267_p12) }
  0x1f   : > { %s753_s23 = sshll.u32 (!%p267_p12), %s983_s21, 1  ;;  %s678_s14 = scalar_lea.hbm (!%p267_p12), %s1102_s7, %s768_s24 }
  0x20   : > { %s303_s25 = scalar_lea.vmem (!%p267_p12), [#allocation4], %s753_s23  ;;  %s666_s15 = scalar_lea.sflag (!%p267_p12), [#allocation5], %s983_s21 }
  0x21   : > { %s680_s30 = sshll.u32 (!%p267_p12), %s303_s25, 4  ;;  %s882_s17 = smov (!%p267_p12), [#allocation4]   ;;  %s681_s30 = int_to_ptr.vmem [resolvable:$true] %s680_s30 }
  0x22   : > { %v879_v4 = vmov 0.0   ;;  %v317_v5 = vld [vmem:[%s1097_s2 + $0x18] sm:$0xff]  ;;  %v880_v6 = vmov 0   ;;  %v315_v7 = vld [vmem:[%s1097_s2 + $0x8] sm:$0xff]  ;;  %v308_v9 = vld [vmem:[%s275_s9 + $0x10] sm:$0xff]  ;;  %vm338_vm0 = vcmask 130048  }
  0x23   : > { %415 = vmatprep.mubr.f32.mxu0 %v879_v4  ;;  %553 = vmatprep.mubr.f32.mxu1 %v879_v4  ;;  %v309_v8 = vld [vmem:[%s275_s9 + $0x18] sm:$0xff]  ;;  %v307_v10 = vld [vmem:[%s275_s9 + $0x8] sm:$0xff]  ;;  %v306_v11 = vld [vmem:[%s275_s9] sm:$0xff]  ;;  %vm476_vm1 = vcmask 261120   ;;  %s817_s16 = scalar_lea.vmem %s681_s30, 32  ;;  %s821_s18 = sshll.u32 %s882_s17, 4  ;;  %s822_s18 = int_to_ptr.vmem [resolvable:$false] %s821_s18 }
  0x24   : > { %811 = vset.pattern.permute.xlu0 %v880_v6  ;;  %812 = vset.pattern.permute.xlu1 %v880_v6  ;;  %v316_v12 = vld [vmem:[%s1097_s2 + $0x10] sm:$0xff]  ;;  %v310_v13 = vld [vmem:[%s1096_s1] sm:$0xff]  ;;  %v311_v16 = vld [vmem:[%s1096_s1 + $0x8] sm:$0xff]  ;;  %p818_p13 = scmp.ne.s32.totalorder %s681_s30, %s817_s16  ;;  %s823_s6 = scalar_lea.vmem %s822_s18, 64 }
  0x25   : > { %335 = vperm.xlu0 %811, %v317_v5   ;;  %325 = vperm.xlu1 %812, %v315_v7   ;;  %v314_v14 = vld [vmem:[%s1097_s2] sm:$0xff]  ;;  %v453_v17 = vld [vmem:[%s1099_s4 + $0x8] sm:$0xff]  ;;  %v454_v18 = vld [vmem:[%s1099_s4 + $0x10] sm:$0xff]  ;;  %p824_p2 = scmp.lt.s32.totalorder %s681_s30, %s822_s18  ;;  %p825_p3 = scmp.lt.s32.totalorder %s823_s6, %s817_s16 }
  0x26   : > { %379 = vmatprep.subr.mxu0 %v309_v8  ;;  %v452_v15 = vld [vmem:[%s1099_s4] sm:$0xff]  ;;  %v312_v19 = vld [vmem:[%s1096_s1 + $0x10] sm:$0xff]  ;;  %v455_v20 = vld [vmem:[%s1099_s4 + $0x18] sm:$0xff]  ;;  %p819_p0 = pnand %p818_p13, %p964_p6 }
  0x27   : > { %380 = vmatpush1.msra.mxu0 %v308_v9  ;;  %v586_v21 = vld [vmem:[%s1100_s5] sm:$0xff]  ;;  %v313_v22 = vld [vmem:[%s1096_s1 + $0x18] sm:$0xff]  ;;  %v587_v23 = vld [vmem:[%s1100_s5 + $0x8] sm:$0xff]  ;;  %p826_p4 = por %p825_p3, %p824_p2 }
  0x28   : > { %381 = vmatprep.subr.mxu0 %v307_v10  ;;  %v588_v24 = vld [vmem:[%s1100_s5 + $0x10] sm:$0xff]  ;;  %v589_v25 = vld [vmem:[%s1100_s5 + $0x18] sm:$0xff]  ;;  %v448_v54 = vld [vmem:[%s1098_s3] sm:$0xff]  ;;  %p820_p1 = pneg %p819_p0 }
  0x29   : > { %382 = vmatpush1.msra.mxu0 %v306_v11  ;;  %330 = vperm.xlu0 %811, %v316_v12   ;;  %v449_v55 = vld [vmem:[%s1098_s3 + $0x8] sm:$0xff]  ;;  %v450_v56 = vld [vmem:[%s1098_s3 + $0x10] sm:$0xff]  ;;  %v451_v57 = vld [vmem:[%s1098_s3 + $0x18] sm:$0xff] }
  0x2a   : > { %754 = vmatmul.mubr.msk.f32.vlgmr.msra.gmra.mxu0 %vm338_vm0, %v310_v13  ;;  %320 = vperm.xlu1 %812, %v314_v14   ;;  %p827_p5 = pnand %p826_p4, %p820_p1 }
  0x2b   : > { %421 = vmatprep.mubr.f32.mxu0 %v879_v4 }
  0x2d   : > { %458 = vperm.xlu0 %811, %v452_v15  }
  0x2e   : > { %755 = vmatmul.mubr.msk.f32.gmra.mxu0 %vm338_vm0, %v311_v16  ;;  %463 = vperm.xlu1 %812, %v453_v17  }
  0x2f   : > { %427 = vmatprep.mubr.f32.mxu0 %v879_v4 }
  0x31   : > { %468 = vperm.xlu0 %811, %v454_v18  }
  0x32   : > { %756 = vmatmul.mubr.msk.f32.gmra.mxu0 %vm338_vm0, %v312_v19  ;;  %473 = vperm.xlu1 %812, %v455_v20  }
  0x33   : > { %433 = vmatprep.mubr.f32.mxu0 %v879_v4 }
  0x35   : > { %592 = vperm.xlu0 %811, %v586_v21  }
  0x36   : > { %757 = vmatmul.mubr.msk.f32.gmra.mxu0 %vm338_vm0, %v313_v22  ;;  %597 = vperm.xlu1 %812, %v587_v23  }
  0x39   : > { %602 = vperm.xlu0 %811, %v588_v24  }
  0x3a   : > { %607 = vperm.xlu1 %812, %v589_v25  }
  0xa0   : > { %v336_v30 = vpop.permute.xlu0 %335  ;;  %v326_v33 = vpop.permute.xlu1 %325 }
  0xa4   : > { %v331_v35 = vpop.permute.xlu0 %330 }
  0xa5   : > { %v321_v41 = vpop.permute.xlu1 %320 }
  0xa8   : > { %v459_v58 = vpop.permute.xlu0 %458 }
  0xa9   : > { %v464_v59 = vpop.permute.xlu1 %463 }
  0xac   : > { %v469_v60 = vpop.permute.xlu0 %468 }
  0xad   : > { %v474_v63 = vpop.permute.xlu1 %473 }
  0xb0   : > { %v593_v3 = vpop.permute.xlu0 %592 }
  0xb1   : > { %v598_v12 = vpop.permute.xlu1 %597 }
  0xb4   : > { %v603_v18 = vpop.permute.xlu0 %602 }
  0xea   : > { %v417_v26 = vpop.f32.mrf.mxu0 }
  0xeb   : > { %v418_v48 = vadd.f32 %v417_v26, %v321_v41 }
  0xec   : > { %v419_v27 = vpop.f32.mrf.mxu0 }
  0xed   : > { %v420_v46 = vadd.f32 %v419_v27, %v321_v41  ;;  %v440_v53 = vmax.f32 %v418_v48, 0.0 }
  0xee   : > { %v423_v28 = vpop.f32.mrf.mxu0 }
  0xef   : > { %v424_v44 = vadd.f32 %v423_v28, %v326_v33  ;;  %v441_v52 = vmax.f32 %v420_v46, 0.0 }
  0xf0   : > { %v425_v29 = vpop.f32.mrf.mxu0 }
  0xf1   : > { %v426_v42 = vadd.f32 %v425_v29, %v326_v33  ;;  %v442_v51 = vmax.f32 %v424_v44, 0.0 }
  0xf2   : > { %v429_v31 = vpop.f32.mrf.mxu0 }
  0xf3   : > { %v430_v40 = vadd.f32 %v429_v31, %v331_v35  ;;  %v443_v50 = vmax.f32 %v426_v42, 0.0  ;;  %v608_v31 = vpop.permute.xlu1 %607 }
  0xf4   : > { %v431_v32 = vpop.f32.mrf.mxu0 }
  0xf5   : > { %v432_v38 = vadd.f32 %v431_v32, %v331_v35  ;;  %v444_v49 = vmax.f32 %v430_v40, 0.0 }
  0xf6   : > { %v435_v34 = vpop.f32.mrf.mxu0 }
  0xf7   : > { %v436_v36 = vadd.f32 %v435_v34, %v336_v30  ;;  %v445_v47 = vmax.f32 %v432_v38, 0.0 }
  0xf8   : > { %v437_v37 = vpop.f32.mrf.mxu0 }
  0xf9   : > { %v438_v39 = vadd.f32 %v437_v37, %v336_v30  ;;  %v446_v45 = vmax.f32 %v436_v36, 0.0 }
  0xfb   : > { %v447_v43 = vmax.f32 %v438_v39, 0.0 }
  0xfd   : > { %513 = vmatprep.subr.mxu1 %v447_v43 }
  0xfe   : > { %514 = vmatpush1.msra.mxu1 %v446_v45 }
  0xff   : > { %515 = vmatprep.subr.mxu1 %v445_v47 }
 0x100   : > { %516 = vmatpush1.msra.mxu1 %v444_v49  ;;  %v637_v49 = vstv %s636_s22 }
 0x101   : > { %517 = vmatprep.subr.mxu1 %v443_v50 }
 0x102   : > { %518 = vmatpush1.msra.mxu1 %v442_v51 }
 0x103   : > { %519 = vmatprep.subr.mxu1 %v441_v52 }
 0x104   : > { %520 = vmatpush1.msra.mxu1 %v440_v53 }
 0x105   : > { %758 = vmatmul.mubr.msk.f32.vlgmr.msra.gmra.mxu1 %vm476_vm1, %v448_v54 }
 0x106   : > { %559 = vmatprep.mubr.f32.mxu1 %v879_v4 }
 0x109   : > { %759 = vmatmul.mubr.msk.f32.gmra.mxu1 %vm476_vm1, %v449_v55  ;;  %v881_v55 = vmov 1966171168  }
 0x10a   : > { %565 = vmatprep.mubr.f32.mxu1 %v879_v4 }
 0x10d   : > { %760 = vmatmul.mubr.msk.f32.gmra.mxu1 %vm476_vm1, %v450_v56  ;;  %v646_v56 = vunpack.c.l.s4 %v881_v55 }
 0x10e   : > { %571 = vmatprep.mubr.f32.mxu1 %v879_v4 }
 0x111   : > { %761 = vmatmul.mubr.msk.f32.gmra.mxu1 %vm476_vm1, %v451_v57  ;;  %v648_v57 = vlaneseq }
 0x113   : > { %vm662_vm2 = vcmp.lt.s32.totalorder %v648_v57, 256 }
 0x1c5   : > { %v555_v61 = vpop.f32.mrf.mxu1 }
 0x1c6   : > { %v556_v0 = vadd.f32 %v555_v61, %v459_v58 }
 0x1c7   : > { %v557_v62 = vpop.f32.mrf.mxu1 }
 0x1c8   : > { %v558_v5 = vadd.f32 %v557_v62, %v459_v58  ;;  %v578_v4 = vmax.f32 %v556_v0, 0.0  ;;  %v647_v58 = vunpack.c.0.s8 %v646_v56 }
 0x1c9   : > { %v561_v1 = vpop.f32.mrf.mxu1 }
 0x1ca   : > { %v562_v2 = vadd.f32 %v561_v1, %v464_v59  ;;  %v579_v13 = vmax.f32 %v558_v5, 0.0  ;;  %v610_v19 = vmul.f32 %v593_v3, %v578_v4 }
 0x1cb   : > { %v563_v6 = vpop.f32.mrf.mxu1 }
 0x1cc   : > { %v580_v7 = vmax.f32 %v562_v2, 0.0  ;;  %v564_v8 = vadd.f32 %v563_v6, %v464_v59  ;;  %v611_v25 = vmul.f32 %v593_v3, %v579_v13  ;;  %v649_v59 = vshrl.u32 %v648_v57, 7 }
 0x1cd   : > { %v567_v9 = vpop.f32.mrf.mxu1 }
 0x1ce   : > { %v581_v10 = vmax.f32 %v564_v8, 0.0  ;;  %v568_v11 = vadd.f32 %v567_v9, %v469_v60  ;;  %v612_v15 = vmul.f32 %v598_v12, %v580_v7  ;;  %v650_v61 = vsub.s32 %v647_v58, %v649_v59 }
 0x1cf   : > { %v569_v14 = vpop.f32.mrf.mxu1 }
 0x1d0   : > { %v582_v16 = vmax.f32 %v568_v11, 0.0  ;;  %v570_v17 = vadd.f32 %v569_v14, %v469_v60  ;;  %v613_v21 = vmul.f32 %v598_v12, %v581_v10  ;;  %v618_v27 = vadd.f32 %v612_v15, %v610_v19 }
 0x1d1   : > { %v573_v20 = vpop.f32.mrf.mxu1 }
 0x1d2   : > { %v614_v22 = vmul.f32 %v603_v18, %v582_v16  ;;  %v583_v23 = vmax.f32 %v570_v17, 0.0  ;;  %v574_v24 = vadd.f32 %v573_v20, %v474_v63  ;;  %v627_v32 = vadd.f32 %v613_v21, %v611_v25 }
 0x1d3   : > { %v575_v26 = vpop.f32.mrf.mxu1 }
 0x1d4   : > { %v615_v28 = vmul.f32 %v603_v18, %v583_v23  ;;  %v584_v29 = vmax.f32 %v574_v24, 0.0  ;;  %v576_v30 = vadd.f32 %v575_v26, %v474_v63  ;;  %v619_v33 = vadd.f32 %v618_v27, %v614_v22 }
 0x1d6   : > { %v616_v34 = vmul.f32 %v608_v31, %v584_v29  ;;  %v585_v35 = vmax.f32 %v576_v30, 0.0  ;;  %v628_v36 = vadd.f32 %v627_v32, %v615_v28 }
 0x1d8   : > { %v620_v37 = vadd.f32 %v619_v33, %v616_v34  ;;  %v617_v38 = vmul.f32 %v608_v31, %v585_v35 }
 0x1da   : > { %v621_v39 = vrot.slane %v620_v37, 4  ;;  %v629_v40 = vadd.f32 %v628_v36, %v617_v38 }
 0x1dc   : > { %v622_v41 = vadd.f32 %v621_v39, %v620_v37  ;;  %v630_v42 = vrot.slane %v629_v40, 4 }
 0x1de   : > { %v623_v43 = vrot.slane %v622_v41, 2  ;;  %v631_v44 = vadd.f32 %v630_v42, %v629_v40 }
 0x1e0   : > { %v624_v45 = vadd.f32 %v623_v43, %v622_v41  ;;  %v632_v46 = vrot.slane %v631_v44, 2 }
 0x1e2   : > { %v625_v47 = vrot.slane %v624_v45, 1  ;;  %v633_v48 = vadd.f32 %v632_v46, %v631_v44 }
 0x1e4   : > { %v626_v50 = vadd.f32 %v625_v47, %v624_v45  ;;  %v634_v51 = vrot.slane %v633_v48, 1 }
 0x1e6   : > { %v638_v52 = vadd.f32 %v637_v49, %v626_v50  ;;  %v635_v53 = vadd.f32 %v634_v51, %v633_v48 }
 0x1e8   : > { %v639_v54 = vadd.f32 %v637_v49, %v635_v53  ;;  %813 = vtanh.f32 %v638_v52 }
 0x1ea   : > { %815 = vtanh.f32 %v639_v54 }
 0x1f5   : > { %v814_v60 = vpop.eup %813 }
 0x1f7   : > { %v816_v62 = vpop.eup %815 }
 0x1f8   : > { %v644_v63 = vcombine.low %v814_v60, %v816_v62 }
 0x1fa   : > { %v651_v0 = vrot.slane %v644_v63, %v650_v61 }
 0x1fc   : > { %v658_v1 = vrot.slane %v651_v0, %v650_v61 }
 0x1fe   : > { %664 = vst.msk [vmem:[%s303_s25] sm:$0x3] %vm662_vm2, %v658_v1 }
 0x1ff   : > { %830 = shalt.err (!%p827_p5)
}
 0x200   : > { %s831_s19 = scalar_lea.hbm %s678_s14, 32  ;;  %s835_s22 = scalar_lea.hbm %s1102_s7, 64 }
 0x201   : > { %p832_p7 = scmp.ne.s32.totalorder %s678_s14, %s831_s19  ;;  %p836_p12 = scmp.lt.s32.totalorder %s678_s14, %s1102_s7 }
 0x202   : > { %p837_p13 = scmp.lt.s32.totalorder %s835_s22, %s831_s19 }
 0x203   : > { %p833_p10 = pnand %p832_p7, %p964_p6 }
 0x204   : > { %p838_p0 = por %p837_p13, %p836_p12 }
 0x205   : > { %p834_p11 = pneg %p833_p10 }
 0x207   : > { %p839_p9 = pnand %p838_p0, %p834_p11 }
 0x209   : > { %842 = shalt.err (!%p839_p9)
}
 0x20a   : > { %769 = dma.vmem_to_hbm [thread:$0]  (%p964_p6), %s681_s30, 32, %s678_s14, %s666_s15  }
 0x20b PF: > { %s692_s25 = sand.u32 1, %s865_s26   ;;  %p1106_p1 = scmp.ge.s32.totalorder %s877_s29, 2 }
 0x20c   : > { %s693_s9 = scalar_lea.sflag [#allocation5], %s692_s25 }
 0x20d   : > { %p772_p2 = pnand %p1106_p1, %p968_p8 }
 0x20f   : > { %p773_p3 = pneg %p772_p2 }
 0x211   : > { %860 = dma.done.wait (%p773_p3), %s693_s9, 32  }
 0x212   : > { %862 = vsyncadd (%p773_p3), %s693_s9, 4294967264  ;;  %p18_p9 = scmp.ge.s32.totalorder %s949_s8, 4   ;;  %s1107_s26 = smov %s869_s27 }
 0x213   : > { %s1108_s27 = smov %s873_s28  ;;  %s1109_s28 = smov %s962_s11 }
 0x214   : > { %s1110_s29 = smov %s949_s8  ;;  %20 = sbr.rel (!%p18_p9) target bundleno = 5 (0x5), region = 111 }
 0x219   :  { %698 = vsyncpa [#allocation5], 1 }
 0x21a   :  { %700 = vsyncpa [#allocation5 + $0x1], 1 }

</bundles_post_ra>
